<compile_context>
chip_gen: v6e
topology: v6e:2x2x1
jax: 0.10.0
libtpu: 0.0.40
codegen_flags: <defaults>
</compile_context>

<pallas_src>
import jax
import jax.numpy as jnp
from jax.experimental import pallas as pl
from jax.experimental.pallas import tpu as pltpu


def _round_up(n: int, m: int) -> int:
    return ((n + m - 1) // m) * m


def _vmem_budget_bytes() -> int:
    """Per-core VMEM budget: physical capacity minus ~8 MiB headroom.

    v5e/v6e have 128 MiB, v7x has 64 MiB per TensorCore; fall back to the
    conservative 64 MiB figure if the trace-time query is unavailable.
    """
    try:
        cap = int(pltpu.get_tpu_info().vmem_capacity_bytes)
    except Exception:  # best-effort hardware query
        cap = 64 << 20
    return max(cap - (8 << 20), 32 << 20)


def mlp_kernel(x_ref, w1_ref, b1_ref, w2_ref, b2_ref, o_ref, acc_ref):
    """One (batch tile, hidden tile) step of fc1 -> ReLU -> fc2."""
    k = pl.program_id(1)

    @pl.when(k == 0)
    def _init():
        acc_ref[...] = jnp.zeros_like(acc_ref)

    # fc1 slice: (TB, Dp) @ (Dp, tH) -> f32 on the MXU; bias + ReLU on the VPU.
    h = jnp.dot(x_ref[...], w1_ref[...], preferred_element_type=jnp.float32)
    h = jnp.maximum(h + b1_ref[...], 0.0)
    # fc2 partial contraction over this hidden slice; cast to the weight dtype
    # (bf16 on the fast path, no-op for f32), accumulate in f32 scratch.
    acc_ref[...] += jnp.dot(h.astype(w2_ref.dtype), w2_ref[...],
                            preferred_element_type=jnp.float32)

    @pl.when(k == pl.num_programs(1) - 1)
    def _finalize():
        o_ref[...] = (acc_ref[...] + b2_ref[...]).astype(o_ref.dtype)


def prepare_mlp_params(w1, b1, w2, b2, *, compute_dtype=None):
    """Pad/cast nn.Linear params once (hoisted out of the per-call path).

    w1: (D, H), b1: (H,), w2: (H, C), b2: (C,) -- already transposed from
    torch's (out_features, in_features) layout.  compute_dtype is the dtype
    fed to the MXU (jnp.bfloat16 recommended on v6e/v7x: ~2x MXU rate and half
    the weight DMA/VMEM); default keeps the weights' dtype (exact nn.Linear
    semantics).
    """
    D, H = w1.shape
    C = w2.shape[1]
    compute_dtype = jnp.dtype(compute_dtype if compute_dtype is not None else w1.dtype)
    Dp, Hp, Cp = (_round_up(D, 128), _round_up(H, 128), _round_up(C, 128))

    def pad2d(w, rows, cols):
        w = w.astype(compute_dtype)
        if w.shape == (rows, cols):
            return w                       # no-copy fast path
        return jnp.zeros((rows, cols), compute_dtype).at[
            :w.shape[0], :w.shape[1]].set(w)

    def pad_bias(b, cols):
        b = b.astype(jnp.float32).reshape(1, -1)
        if b.shape[1] == cols:
            return b
        return jnp.zeros((1, cols), jnp.float32).at[:, :b.shape[1]].set(b)

    return {
        "w1": pad2d(w1, Dp, Hp),
        "b1": pad_bias(b1, Hp),
        "w2": pad2d(w2, Hp, Cp),
        "b2": pad_bias(b2, Cp),
        "dims": (D, H, C),
        "compute_dtype": compute_dtype,
    }


def mlp_forward(x, params, *, block_b=256, hidden_block=None):
    """Fused MLP forward.  x: (B, ...) flattened to (B, D); returns (B, C)."""
    D, H, C = params["dims"]
    w1p, b1p, w2p, b2p = params["w1"], params["b1"], params["w2"], params["b2"]
    compute_dtype = params["compute_dtype"]
    Dp, Hp = w1p.shape
    Cp = w2p.shape[1]

    B = x.shape[0]
    x2d = x.reshape(B, -1)
    if x2d.shape[1] != D:
        raise ValueError(f"flattened input dim {x2d.shape[1]} != fc1 in_dim {D}")
    out_dtype = x2d.dtype

    c_item = jnp.dtype(compute_dtype).itemsize
    o_item = jnp.dtype(out_dtype).itemsize
    budget = _vmem_budget_bytes()

    # Batch tile: 256 rows fills the 256-wide v6e/v7x MXU and amortizes
    # per-grid-step overhead; small batches use a sublane-aligned tile
    # (8 rows f32 / 16 rows bf16) instead of padding to 128+.
    sub = max(8, 32 // c_item)
    TB = _round_up(min(block_b, _round_up(B, sub)), sub)

    def vmem_need(tb, th, n_h):
        nbw = 1 if n_h == 1 else 2            # weight buffers (single if resident)
        return (2 * tb * Dp * c_item          # x tile (double-buffered)
                + 2 * tb * Cp * o_item        # out tile (double-buffered)
                + nbw * (Dp * th + th * Cp) * c_item   # w1 / w2 tiles
                + nbw * th * 4 + Cp * 4                # biases (f32)
                + tb * Cp * 4                          # f32 accumulator scratch
                + 2 * tb * th * 4)                     # f32 hidden + temporaries

    units = Hp // 128
    # Shrink the batch tile first if even a 128-wide hidden tile would blow the
    # budget (very large D or C).
    # TODO(synk): also tile D / C for extreme widths instead of only shrinking TB.
    while TB > sub and vmem_need(TB, 128, units) > budget:
        TB = max(sub, _round_up(TB // 2, sub))
    Bp = _round_up(B, TB)
    grid_b = Bp // TB

    # Hidden tile: largest divisor of Hp (in 128-lane units) that fits VMEM;
    # n_h == 1 keeps the full weights VMEM-resident across all batch tiles.
    if hidden_block is not None:
        req = max(1, min(units, _round_up(hidden_block, 128) // 128))
        th_units = max(d for d in range(1, units + 1)
                       if units % d == 0 and d <= req)
        n_h = units // th_units
    else:
        n_h = units
        for cand in range(1, units + 1):
            if units % cand:
                continue
            if vmem_need(TB, (units // cand) * 128, cand) <= budget:
                n_h = cand
                break
    tH = (units // n_h) * 128

    # Pad/cast x only when needed (no-copy fast path for aligned shapes).
    if x2d.shape == (Bp, Dp) and x2d.dtype == compute_dtype:
        xp = x2d
    else:
        xp = jnp.zeros((Bp, Dp), compute_dtype).at[:B, :D].set(
            x2d.astype(compute_dtype))

    # Constant-index blocks are never re-DMA'd; single-buffer them so the
    # resident footprint is 1x (matters on v7x's 64 MiB per-core VMEM).
    def spec(shape, index_map, resident=False):
        if resident:
            return pl.BlockSpec(shape, index_map, pipeline_mode=pl.Buffered(1))
        return pl.BlockSpec(shape, index_map)

    w_resident = n_h == 1
    x_resident = grid_b == 1

    need = vmem_need(TB, tH, n_h)
    vmem_limit = int(min(max(need + (8 << 20), 32 << 20), budget))

    flops = 2 * Bp * (Dp * Hp + Hp * Cp)
    bytes_accessed = (Bp * Dp * c_item + (Dp * Hp + Hp * Cp) * c_item
                      + (Hp + Cp) * 4 + Bp * Cp * o_item)

    out = pl.pallas_call(
        mlp_kernel,
        out_shape=jax.ShapeDtypeStruct((Bp, Cp), out_dtype),
        grid=(grid_b, n_h),
        in_specs=[
            spec((TB, Dp), lambda i, k: (i, 0), x_resident),   # x (per batch tile)
            spec((Dp, tH), lambda i, k: (0, k), w_resident),   # w1 slice
            spec((1, tH), lambda i, k: (0, k), w_resident),    # b1 slice
            spec((tH, Cp), lambda i, k: (k, 0), w_resident),   # w2 slice
            spec((1, Cp), lambda i, k: (0, 0), True),          # b2 (constant)
        ],
        out_specs=pl.BlockSpec((TB, Cp), lambda i, k: (i, 0)),
        scratch_shapes=[pltpu.VMEM((TB, Cp), jnp.float32)],
        compiler_params=pltpu.CompilerParams(
            dimension_semantics=("parallel", "arbitrary"),  # megacore on v7x
            vmem_limit_bytes=vmem_limit,
        ),
        cost_estimate=pl.CostEstimate(
            flops=flops, transcendentals=0, bytes_accessed=int(bytes_accessed)),
    )(xp, w1p, b1p, w2p, b2p)

    if (Bp, Cp) != (B, C):
        out = out[:B, :C]
    return out


if __name__ == "__main__":
    # Shapes implied by MLP(input_dim, hidden_dim, num_classes); x.view(B, -1)
    # is the identity for 2-D input.
    batch, input_dim, hidden_dim, num_classes = 8, 64, 32, 16

    key = jax.random.PRNGKey(0)
    kx, kw1, kb1, kw2, kb2, kw3, kb3, kw4, kb4 = jax.random.split(key, 9)

    x = jax.random.normal(kx, (batch, input_dim), dtype=jnp.float32)

    # nn.Linear params (W (out, in), b (out,)) stored transposed as (in, out).
    w1 = jax.random.normal(kw1, (input_dim, hidden_dim), jnp.float32) * 0.05
    b1 = jax.random.normal(kb1, (hidden_dim,), jnp.float32) * 0.05
    w2 = jax.random.normal(kw2, (hidden_dim, num_classes), jnp.float32) * 0.05
    b2 = jax.random.normal(kb2, (num_classes,), jnp.float32) * 0.05

    ref = jnp.maximum(x @ w1 + b1, 0.0) @ w2 + b2

    # 1) f32 path: exact semantics of the PyTorch module.
    params = prepare_mlp_params(w1, b1, w2, b2)
    out = jax.block_until_ready(mlp_forward(x, params))
    assert out.shape == (batch, num_classes)
    assert out.dtype == ref.dtype
    assert jnp.allclose(out, ref, atol=1e-5, rtol=1e-5)

    # 2) bf16-MXU fast path (v6e/v7x): bf16 inputs, f32 accumulation/epilogue.
    params_bf16 = prepare_mlp_params(w1, b1, w2, b2, compute_dtype=jnp.bfloat16)
    out_bf16 = jax.block_until_ready(mlp_forward(x, params_bf16))
    assert out_bf16.shape == (batch, num_classes)
    assert jnp.allclose(out_bf16, ref, atol=5e-2, rtol=5e-2)

    # 3) Force hidden-dim tiling (2 accumulation steps over the "arbitrary"
    #    axis) to exercise the pl.when init/accumulate/finalize path.
    hidden2 = 256
    w1b = jax.random.normal(kw3, (input_dim, hidden2), jnp.float32) * 0.05
    b1b = jax.random.normal(kb3, (hidden2,), jnp.float32) * 0.05
    w2b = jax.random.normal(kw4, (hidden2, num_classes), jnp.float32) * 0.05
    b2b = jax.random.normal(kb4, (num_classes,), jnp.float32) * 0.05
    ref2 = jnp.maximum(x @ w1b + b1b, 0.0) @ w2b + b2b
    params2 = prepare_mlp_params(w1b, b1b, w2b, b2b)
    out2 = jax.block_until_ready(mlp_forward(x, params2, hidden_block=128))
    assert out2.shape == (batch, num_classes)
    assert jnp.allclose(out2, ref2, atol=1e-4, rtol=1e-4)

    print("KERNEL_OK")
</pallas_src>

<mosaic_0001>
module attributes {stable_mosaic.version = 11 : i64} {
  func.func @mlp_kernel(%arg0: i32, %arg1: i32, %arg2: memref<8x128xf32, #tpu.memory_space<vmem>>, %arg3: memref<128x128xf32, #tpu.memory_space<vmem>>, %arg4: memref<1x128xf32, #tpu.memory_space<vmem>>, %arg5: memref<128x128xf32, #tpu.memory_space<vmem>>, %arg6: memref<1x128xf32, #tpu.memory_space<vmem>>, %arg7: memref<8x128xf32, #tpu.memory_space<vmem>>, %arg8: memref<8x128xf32, #tpu.memory_space<vmem>>) attributes {dimension_semantics = [#tpu.dimension_semantics<parallel>, #tpu.dimension_semantics<arbitrary>], iteration_bounds = array<i64: 1, 1>, scalar_prefetch = 0 : i64, scratch_operands = 1 : i64, tpu.core_type = #tpu.core_type<tc>, window_params = [{pipeline_mode = #tpu.pipeline_mode<synchronous>, transform_indices = @transform_0, window_bounds = array<i64: 8, 128>}, {pipeline_mode = #tpu.pipeline_mode<synchronous>, transform_indices = @transform_1, window_bounds = array<i64: 128, 128>}, {pipeline_mode = #tpu.pipeline_mode<synchronous>, transform_indices = @transform_2, window_bounds = array<i64: 1, 128>}, {pipeline_mode = #tpu.pipeline_mode<synchronous>, transform_indices = @transform_3, window_bounds = array<i64: 128, 128>}, {pipeline_mode = #tpu.pipeline_mode<synchronous>, transform_indices = @transform_4, window_bounds = array<i64: 1, 128>}, {transform_indices = @transform_5, window_bounds = array<i64: 8, 128>}]} {
    %c0_i32 = arith.constant 0 : i32
    %0 = arith.cmpi eq, %arg1, %c0_i32 : i32
    %1 = arith.extui %0 : i1 to i32
    %c0_i32_0 = arith.constant 0 : i32
    %2 = arith.cmpi ne, %1, %c0_i32_0 : i32
    scf.if %2 {
      %cst_16 = arith.constant 0.000000e+00 : f32
      %19 = vector.broadcast %cst_16 : f32 to vector<8x128xf32>
      %c0_17 = arith.constant 0 : index
      %c0_18 = arith.constant 0 : index
      %20 = vector.load %arg8[%c0_17, %c0_18] : memref<8x128xf32, #tpu.memory_space<vmem>>, vector<8x128xf32>
      tpu.vector_store %arg8[%c0_17, %c0_18], %19 {strides = array<i32>} : memref<8x128xf32, #tpu.memory_space<vmem>>, vector<8x128xf32>,
    } else {
    }
    %c0 = arith.constant 0 : index
    %c0_1 = arith.constant 0 : index
    %3 = vector.load %arg2[%c0, %c0_1] : memref<8x128xf32, #tpu.memory_space<vmem>>, vector<8x128xf32>
    %c0_2 = arith.constant 0 : index
    %c0_3 = arith.constant 0 : index
    %4 = vector.load %arg3[%c0_2, %c0_3] : memref<128x128xf32, #tpu.memory_space<vmem>>, vector<128x128xf32>
    %cst = arith.constant dense<0.000000e+00> : vector<8x128xf32>
    %5 = tpu.matmul %3, %4, %cst {dimension_numbers = #tpu.dot_dimension_numbers<[1], [0], [0], [1], [0, 0, 1, 1], [], []>} : vector<8x128xf32>, vector<128x128xf32>, vector<8x128xf32> -> vector<8x128xf32>
    %c0_4 = arith.constant 0 : index
    %c0_5 = arith.constant 0 : index
    %6 = vector.load %arg4[%c0_4, %c0_5] : memref<1x128xf32, #tpu.memory_space<vmem>>, vector<1x128xf32>
    %7 = vector.broadcast %6 : vector<1x128xf32> to vector<8x128xf32>
    %8 = arith.addf %5, %7 : vector<8x128xf32>
    %cst_6 = arith.constant 0.000000e+00 : f32
    %9 = vector.broadcast %cst_6 : f32 to vector<8x128xf32>
    %10 = arith.maximumf %8, %9 : vector<8x128xf32>
    %c0_7 = arith.constant 0 : index
    %c0_8 = arith.constant 0 : index
    %11 = vector.load %arg8[%c0_7, %c0_8] : memref<8x128xf32, #tpu.memory_space<vmem>>, vector<8x128xf32>
    %c0_9 = arith.constant 0 : index
    %c0_10 = arith.constant 0 : index
    %12 = vector.load %arg5[%c0_9, %c0_10] : memref<128x128xf32, #tpu.memory_space<vmem>>, vector<128x128xf32>
    %cst_11 = arith.constant dense<0.000000e+00> : vector<8x128xf32>
    %13 = tpu.matmul %10, %12, %cst_11 {dimension_numbers = #tpu.dot_dimension_numbers<[1], [0], [0], [1], [0, 0, 1, 1], [], []>} : vector<8x128xf32>, vector<128x128xf32>, vector<8x128xf32> -> vector<8x128xf32>
    %14 = arith.addf %11, %13 : vector<8x128xf32>
    %c0_12 = arith.constant 0 : index
    %c0_13 = arith.constant 0 : index
    %15 = vector.load %arg8[%c0_12, %c0_13] : memref<8x128xf32, #tpu.memory_space<vmem>>, vector<8x128xf32>
    tpu.vector_store %arg8[%c0_12, %c0_13], %14 {strides = array<i32>} : memref<8x128xf32, #tpu.memory_space<vmem>>, vector<8x128xf32>,
    %c0_i32_14 = arith.constant 0 : i32
    %16 = arith.cmpi eq, %arg1, %c0_i32_14 : i32
    %17 = arith.extui %16 : i1 to i32
    %c0_i32_15 = arith.constant 0 : i32
    %18 = arith.cmpi ne, %17, %c0_i32_15 : i32
    scf.if %18 {
      %c0_16 = arith.constant 0 : index
      %c0_17 = arith.constant 0 : index
      %19 = vector.load %arg8[%c0_16, %c0_17] : memref<8x128xf32, #tpu.memory_space<vmem>>, vector<8x128xf32>
      %c0_18 = arith.constant 0 : index
      %c0_19 = arith.constant 0 : index
      %20 = vector.load %arg6[%c0_18, %c0_19] : memref<1x128xf32, #tpu.memory_space<vmem>>, vector<1x128xf32>
      %21 = vector.broadcast %20 : vector<1x128xf32> to vector<8x128xf32>
      %22 = arith.addf %19, %21 : vector<8x128xf32>
      %c0_20 = arith.constant 0 : index
      %c0_21 = arith.constant 0 : index
      %23 = vector.load %arg7[%c0_20, %c0_21] : memref<8x128xf32, #tpu.memory_space<vmem>>, vector<8x128xf32>
      tpu.vector_store %arg7[%c0_20, %c0_21], %22 {strides = array<i32>} : memref<8x128xf32, #tpu.memory_space<vmem>>, vector<8x128xf32>,
    } else {
    }
    return
  }
  func.func @transform_0(%arg0: i32, %arg1: i32) -> (i32, i32) {
    %c0_i32 = arith.constant 0 : i32
    %c0_i32_0 = arith.constant 0 : i32
    return %arg0, %c0_i32 : i32, i32
  }
  func.func @transform_1(%arg0: i32, %arg1: i32) -> (i32, i32) {
    %c0_i32 = arith.constant 0 : i32
    %c0_i32_0 = arith.constant 0 : i32
    return %c0_i32, %arg1 : i32, i32
  }
  func.func @transform_2(%arg0: i32, %arg1: i32) -> (i32, i32) {
    %c0_i32 = arith.constant 0 : i32
    %c0_i32_0 = arith.constant 0 : i32
    return %c0_i32, %arg1 : i32, i32
  }
  func.func @transform_3(%arg0: i32, %arg1: i32) -> (i32, i32) {
    %c0_i32 = arith.constant 0 : i32
    %c0_i32_0 = arith.constant 0 : i32
    return %arg1, %c0_i32 : i32, i32
  }
  func.func @transform_4(%arg0: i32, %arg1: i32) -> (i32, i32) {
    %c0_i32 = arith.constant 0 : i32
    %c0_i32_0 = arith.constant 0 : i32
    %c0_i32_1 = arith.constant 0 : i32
    return %c0_i32, %c0_i32_0 : i32, i32
  }
  func.func @transform_5(%arg0: i32, %arg1: i32) -> (i32, i32) {
    %c0_i32 = arith.constant 0 : i32
    %c0_i32_0 = arith.constant 0 : i32
    return %arg0, %c0_i32 : i32, i32
  }
}

</mosaic_0001>

<bundles_post_ra>
// kernel: tpu_custom_call.1
= control target key start
LH: loop header
LB: loop body
LE: loop exit
PB: predicated region body
PF: predicated region fallthrough
CT: control target
= control target key end

     0   :  { %10 = vsyncpa [#allocation4], 0  ;;  %s568_s0 = inlined_call_operand.hbm [shape: f32[8,128], index: 0, kind: input, shape index: {}]   ;;  %s569_s1 = inlined_call_operand.hbm [shape: f32[128,128], index: 1, kind: input, shape index: {}]   ;;  %s570_s2 = inlined_call_operand.vmem [shape: f32[1,128], index: 2, kind: input, shape index: {}]   ;;  %s571_s3 = inlined_call_operand.hbm [shape: f32[128,128], index: 3, kind: input, shape index: {}]   ;;  %s572_s4 = inlined_call_operand.vmem [shape: f32[1,128], index: 4, kind: input, shape index: {}]   ;;  %s573_s5 = inlined_call_operand.hbm [shape: f32[8,128], index: 5, kind: output, shape index: {}]  }
   0x1   :  { %11 = vsyncpa [#allocation7], 0 }
   0x2   :  { %12 = vsyncpa [#allocation5], 0  ;;  %s478_s18 = smov [#allocation6]  }
   0x3   :  { %s28_s19 = sshll.u32 %s478_s18, 4  ;;  %s29_s19 = int_to_ptr.vmem [resolvable:$true] %s28_s19 }
   0x4   :  { %s400_s20 = scalar_lea.vmem %s29_s19, 2048  ;;  %p405_p1 = scmp.lt.s32.totalorder %s29_s19, %s29_s19 }
   0x5   :  { %p401_p0 = scmp.ne.s32.totalorder %s29_s19, %s400_s20  ;;  %p406_p2 = scmp.lt.s32.totalorder %s400_s20, %s400_s20 }
   0x7   :  { %p407_p3 = por %p406_p2, %p405_p1 }
   0x9   :  { %p408_p4 = pnand %p407_p3, %p401_p0 }
   0xb   :  { %411 = shalt.err (!%p408_p4)
}
   0xc   :  { %s479_s21 = smov 128   ;;  %s480_s22 = smov 8  }
   0xd   :  { %34 = dma.hbm_to_vmem [thread:$0]  %s569_s1, 2048, %s29_s19, [#allocation7], %s479_s21, %s479_s21, %s480_s22  }
   0xe   :  { %s481_s25 = smov [#allocation3]   ;;  %s482_s27 = smov [#allocation8]  }
   0xf   :  { %s19_s26 = sshll.u32 %s481_s25, 4  ;;  %s42_s28 = sshll.u32 %s482_s27, 4  ;;  %s20_s26 = int_to_ptr.vmem [resolvable:$true] %s19_s26  ;;  %s43_s28 = int_to_ptr.vmem [resolvable:$true] %s42_s28 }
  0x10   :  { %s420_s29 = scalar_lea.vmem %s20_s26, 128  ;;  %p425_p6 = scmp.lt.s32.totalorder %s20_s26, %s20_s26 }
  0x11   :  { %p421_p5 = scmp.ne.s32.totalorder %s20_s26, %s420_s29  ;;  %p426_p7 = scmp.lt.s32.totalorder %s420_s29, %s420_s29 }
  0x13   :  { %p427_p8 = por %p426_p7, %p425_p6 }
  0x15   :  { %p428_p9 = pnand %p427_p8, %p421_p5 }
  0x17   :  { %431 = shalt.err (!%p428_p9)
}
  0x18   :  { %22 = dma.hbm_to_vmem [thread:$0]  %s568_s0, 128, %s20_s26, [#allocation4]  }
  0x19   :  { %s440_s7 = scalar_lea.vmem %s43_s28, 2048  ;;  %p445_p11 = scmp.lt.s32.totalorder %s43_s28, %s43_s28 }
  0x1a   :  { %p441_p10 = scmp.ne.s32.totalorder %s43_s28, %s440_s7  ;;  %p446_p12 = scmp.lt.s32.totalorder %s440_s7, %s440_s7 }
  0x1c   :  { %p447_p13 = por %p446_p12, %p445_p11 }
  0x1e   :  { %p448_p0 = pnand %p447_p13, %p441_p10 }
  0x20   :  { %451 = shalt.err (!%p448_p0)
}
  0x21   :  { %48 = dma.hbm_to_vmem [thread:$0]  %s571_s3, 2048, %s43_s28, [#allocation7], %s479_s21, %s479_s21, %s480_s22  }
  0x22   :  { %472 = dma.done.wait [#allocation4], 128  }
  0x23   :  { %473 = vsyncadd [#allocation4], 4294967168 }
  0x24   :  { %474 = dma.done.wait [#allocation7], 4096  }
  0x25   :  { %475 = vsyncadd [#allocation7], 4294963200  ;;  %v483_v0 = vmov 0.0   ;;  %vm484_vm0 = vmmov 0   ;;  %v81_v1 = vld [vmem:[#allocation6 + $0x78] sm:$0xff]  ;;  %v80_v2 = vld [vmem:[#allocation6 + $0x70] sm:$0xff] }
  0x26   :  { %314 = vmatprep.subr.mxu0 %v483_v0  ;;  %346 = vmatprep.mubr.msk.f32.mxu0 %vm484_vm0, %v483_v0  ;;  %v79_v3 = vld [vmem:[#allocation6 + $0x68] sm:$0xff]  ;;  %v78_v4 = vld [vmem:[#allocation6 + $0x60] sm:$0xff]  ;;  %v176_v5 = vld [vmem:[#allocation8 + $0x78] sm:$0xff]  ;;  %s485_s11 = smov [#allocation9]  }
  0x27   :  { %349 = vmatprep.subr.mxu1 %v483_v0  ;;  %381 = vmatprep.mubr.msk.f32.mxu1 %vm484_vm0, %v483_v0  ;;  %v77_v6 = vld [vmem:[#allocation6 + $0x58] sm:$0xff]  ;;  %v175_v7 = vld [vmem:[#allocation8 + $0x70] sm:$0xff]  ;;  %v174_v8 = vld [vmem:[#allocation8 + $0x68] sm:$0xff]  ;;  %s268_s12 = sshll.u32 %s485_s11, 4  ;;  %s269_s12 = int_to_ptr.vmem [resolvable:$true] %s268_s12 }
  0x28   :  { %315 = vmatpush3.msra.mxu0 %v81_v1  ;;  %350 = vmatpush3.msra.mxu1 %v176_v5  ;;  %v76_v9 = vld [vmem:[#allocation6 + $0x50] sm:$0xff]  ;;  %v173_v10 = vld [vmem:[#allocation8 + $0x60] sm:$0xff]  ;;  %v75_v11 = vld [vmem:[#allocation6 + $0x48] sm:$0xff]  ;;  %s452_s13 = scalar_lea.vmem %s269_s12, 128  ;;  %p457_p2 = scmp.lt.s32.totalorder %s269_s12, %s269_s12 }
  0x29   :  { %316 = vmatprep.subr.mxu0 %v483_v0  ;;  %351 = vmatprep.subr.mxu1 %v483_v0  ;;  %v172_v12 = vld [vmem:[#allocation8 + $0x58] sm:$0xff]  ;;  %v74_v13 = vld [vmem:[#allocation6 + $0x40] sm:$0xff]  ;;  %v171_v14 = vld [vmem:[#allocation8 + $0x50] sm:$0xff]  ;;  %p453_p1 = scmp.ne.s32.totalorder %s269_s12, %s452_s13  ;;  %p458_p3 = scmp.lt.s32.totalorder %s452_s13, %s452_s13 }
  0x2a   :  { %317 = vmatpush3.msra.mxu0 %v80_v2  ;;  %352 = vmatpush3.msra.mxu1 %v175_v7  ;;  %v73_v15 = vld [vmem:[#allocation6 + $0x38] sm:$0xff]  ;;  %v170_v16 = vld [vmem:[#allocation8 + $0x48] sm:$0xff]  ;;  %v72_v17 = vld [vmem:[#allocation6 + $0x30] sm:$0xff] }
  0x2b   :  { %318 = vmatprep.subr.mxu0 %v483_v0  ;;  %353 = vmatprep.subr.mxu1 %v483_v0  ;;  %v169_v18 = vld [vmem:[#allocation8 + $0x40] sm:$0xff]  ;;  %v71_v19 = vld [vmem:[#allocation6 + $0x28] sm:$0xff]  ;;  %v168_v20 = vld [vmem:[#allocation8 + $0x38] sm:$0xff]  ;;  %p459_p4 = por %p458_p3, %p457_p2 }
  0x2c   :  { %319 = vmatpush3.msra.mxu0 %v79_v3  ;;  %354 = vmatpush3.msra.mxu1 %v174_v8  ;;  %v70_v21 = vld [vmem:[#allocation6 + $0x20] sm:$0xff]  ;;  %v167_v22 = vld [vmem:[#allocation8 + $0x30] sm:$0xff]  ;;  %v69_v23 = vld [vmem:[#allocation6 + $0x18] sm:$0xff] }
  0x2d   :  { %320 = vmatprep.subr.mxu0 %v483_v0  ;;  %355 = vmatprep.subr.mxu1 %v483_v0  ;;  %v166_v24 = vld [vmem:[#allocation8 + $0x28] sm:$0xff]  ;;  %v68_v25 = vld [vmem:[#allocation6 + $0x10] sm:$0xff]  ;;  %v165_v26 = vld [vmem:[#allocation8 + $0x20] sm:$0xff]  ;;  %p460_p5 = pnand %p459_p4, %p453_p1 }
  0x2e   :  { %321 = vmatpush3.msra.mxu0 %v78_v4  ;;  %356 = vmatpush3.msra.mxu1 %v173_v10  ;;  %v67_v27 = vld [vmem:[#allocation6 + $0x8] sm:$0xff]  ;;  %v164_v28 = vld [vmem:[#allocation8 + $0x18] sm:$0xff]  ;;  %v66_v29 = vld [vmem:[#allocation6] sm:$0xff] }
  0x2f   :  { %322 = vmatprep.subr.mxu0 %v483_v0  ;;  %357 = vmatprep.subr.mxu1 %v483_v0  ;;  %v65_v30 = vld [vmem:[#allocation3] sm:$0xff]  ;;  %v163_v31 = vld [vmem:[#allocation8 + $0x10] sm:$0xff]  ;;  %v162_v32 = vld [vmem:[#allocation8 + $0x8] sm:$0xff] }
  0x30   :  { %323 = vmatpush3.msra.mxu0 %v77_v6  ;;  %358 = vmatpush3.msra.mxu1 %v172_v12  ;;  %v161_v33 = vld [vmem:[#allocation8] sm:$0xff]  ;;  %v278_v34 = vld [vmem:[%s570_s2] ss:$0 sm:$0xff] }
  0x31   :  { %324 = vmatprep.subr.mxu0 %v483_v0  ;;  %359 = vmatprep.subr.mxu1 %v483_v0  ;;  %v279_v39 = vld [vmem:[%s572_s4] ss:$0 sm:$0xff] }
  0x32   :  { %325 = vmatpush3.msra.mxu0 %v76_v9  ;;  %360 = vmatpush3.msra.mxu1 %v171_v14 }
  0x33   :  { %326 = vmatprep.subr.mxu0 %v483_v0  ;;  %361 = vmatprep.subr.mxu1 %v483_v0 }
  0x34   :  { %327 = vmatpush3.msra.mxu0 %v75_v11  ;;  %362 = vmatpush3.msra.mxu1 %v170_v16 }
  0x35   :  { %328 = vmatprep.subr.mxu0 %v483_v0  ;;  %363 = vmatprep.subr.mxu1 %v483_v0 }
  0x36   :  { %329 = vmatpush3.msra.mxu0 %v74_v13  ;;  %364 = vmatpush3.msra.mxu1 %v169_v18 }
  0x37   :  { %330 = vmatprep.subr.mxu0 %v483_v0  ;;  %365 = vmatprep.subr.mxu1 %v483_v0 }
  0x38   :  { %331 = vmatpush3.msra.mxu0 %v73_v15  ;;  %366 = vmatpush3.msra.mxu1 %v168_v20 }
  0x39   :  { %332 = vmatprep.subr.mxu0 %v483_v0  ;;  %367 = vmatprep.subr.mxu1 %v483_v0 }
  0x3a   :  { %333 = vmatpush3.msra.mxu0 %v72_v17  ;;  %368 = vmatpush3.msra.mxu1 %v167_v22 }
  0x3b   :  { %334 = vmatprep.subr.mxu0 %v483_v0  ;;  %369 = vmatprep.subr.mxu1 %v483_v0 }
  0x3c   :  { %335 = vmatpush3.msra.mxu0 %v71_v19  ;;  %370 = vmatpush3.msra.mxu1 %v166_v24 }
  0x3d   :  { %336 = vmatprep.subr.mxu0 %v483_v0  ;;  %371 = vmatprep.subr.mxu1 %v483_v0 }
  0x3e   :  { %337 = vmatpush3.msra.mxu0 %v70_v21  ;;  %372 = vmatpush3.msra.mxu1 %v165_v26 }
  0x3f   :  { %338 = vmatprep.subr.mxu0 %v483_v0  ;;  %373 = vmatprep.subr.mxu1 %v483_v0 }
  0x40   :  { %339 = vmatpush3.msra.mxu0 %v69_v23  ;;  %374 = vmatpush3.msra.mxu1 %v164_v28 }
  0x41   :  { %340 = vmatprep.subr.mxu0 %v483_v0  ;;  %375 = vmatprep.subr.mxu1 %v483_v0 }
  0x42   :  { %341 = vmatpush3.msra.mxu0 %v68_v25  ;;  %376 = vmatpush3.msra.mxu1 %v163_v31 }
  0x43   :  { %342 = vmatprep.subr.mxu0 %v483_v0  ;;  %377 = vmatprep.subr.mxu1 %v483_v0 }
  0x44   :  { %343 = vmatpush3.msra.mxu0 %v67_v27  ;;  %378 = vmatpush3.msra.mxu1 %v162_v32 }
  0x45   :  { %344 = vmatprep.subr.mxu0 %v483_v0  ;;  %379 = vmatprep.subr.mxu1 %v483_v0 }
  0x46   :  { %345 = vmatpush3.msra.mxu0 %v66_v29  ;;  %380 = vmatpush3.msra.mxu1 %v161_v33 }
  0x47   :  { %347 = vmatmul.mubr.f32.vlgmr.msra.gmra.mxu0 %v65_v30 }
 0x107   :  { %v155_v35 = vpop.f32.mrf.mxu0 }
 0x108   :  { %v156_v36 = vadd.f32 %v278_v34, %v155_v35 }
 0x109   :  { %v348_v37 = vpop.f32.mrf.mxu0 }
 0x10a   :  { %v159_v38 = vmax.f32 %v156_v36, 0.0 }
 0x10c   :  { %382 = vmatmul.mubr.f32.vlgmr.msra.gmra.mxu1 %v159_v38 }
 0x1cc   :  { %v243_v40 = vpop.f32.mrf.mxu1 }
 0x1cd   :  { %v260_v41 = vadd.f32 %v279_v39, %v243_v40 }
 0x1ce   :  { %v383_v42 = vpop.f32.mrf.mxu1 }
 0x1cf   :  { %261 = vst [vmem:[#allocation9] sm:$0xff] %v260_v41 }
 0x1d0   :  { %463 = shalt.err (!%p460_p5)
}
 0x1d1   :  { %271 = dma.vmem_to_hbm [thread:$0]  %s269_s12, 128, %s573_s5, [#allocation5]  }
 0x1d2   :  { %476 = dma.done.wait [#allocation5], 128  }
 0x1d3   :  { %477 = vsyncadd [#allocation5], 4294967168 }
 0x1d4   :  { %275 = vsyncpa [#allocation4], 1 }
 0x1d5   :  { %276 = vsyncpa [#allocation7], 1 }
 0x1d6   :  { %277 = vsyncpa [#allocation5], 1 }

</bundles_post_ra>
